<compile_context>
chip_gen: v6e
topology: v6e:2x2x1
jax: 0.10.0
libtpu: 0.0.40
codegen_flags: <defaults>
</compile_context>

<pallas_src>
import functools

import jax
import jax.numpy as jnp
from jax import lax
from jax.experimental import pallas as pl
from jax.experimental.pallas import tpu as pltpu

_LANE = 128
_SUBLANE = 8
_MAX_BATCH_TILE = 256


def _round_up(x, m):
    return ((x + m - 1) // m) * m


# --------------------------------------------------------------------------
# Kernel body: one batch tile, weights VMEM-resident across grid steps.
# --------------------------------------------------------------------------
def _lista_kernel(y_ref, wt_ref, b_ref, st_ref, out_ref, *, num_iter):
    # Cast y to bf16 in-kernel (VPU op, hidden under the MXU work).
    y = y_ref[...].astype(jnp.bfloat16)     # (TB, D)   bf16
    Wt = wt_ref[...]                        # (D, Cp)   bf16  (W.T, zero-padded)
    bias = b_ref[...]                       # (1, Cp)   f32   (zero-padded)
    St = st_ref[...]                        # (Cp, Cp)  f32   (S.T, zero-padded)

    # Bm = y @ W.T + bias  -- MXU matmul, f32 accumulation, no transpose.
    Bm = jnp.dot(y, Wt, preferred_element_type=jnp.float32) + bias
    Z = jnp.maximum(Bm, 0.0)

    # for t in range(T): Z = relu(Bm + Z @ S.T)   (recurrence kept in f32 so
    # rounding error does not compound through the iterations)
    def body(t, Z_cur):
        C = Bm + jnp.dot(Z_cur, St, preferred_element_type=jnp.float32)
        return jnp.maximum(C, 0.0)

    Z = lax.fori_loop(0, num_iter, body, Z, unroll=True)

    out_ref[...] = Z


# --------------------------------------------------------------------------
# One-time parameter preparation (cache the result; do NOT rebuild per call).
# --------------------------------------------------------------------------
def prepare_lista_params(W, bias, S):
    """Pre-transpose, zero-pad code_dim to a multiple of 128, cast W to bf16.

    Zero padding is exact for this linear+ReLU recurrence: padded bias lanes
    are 0 and padded rows AND columns of S.T are 0, so padded Z lanes stay 0.
    """
    code_dim, in_dim = W.shape
    cp = _round_up(code_dim, _LANE)

    Wt_bf = (jnp.zeros((in_dim, cp), jnp.float32)
             .at[:, :code_dim].set(W.T).astype(jnp.bfloat16))
    bias_p = jnp.zeros((1, cp), jnp.float32).at[:, :code_dim].set(bias)
    St_f32 = jnp.zeros((cp, cp), jnp.float32).at[:code_dim, :code_dim].set(S.T)

    return {"Wt": Wt_bf, "bias": bias_p, "St": St_f32,
            "code_dim": code_dim, "in_dim": in_dim, "cp": cp}


# --------------------------------------------------------------------------
# Forward pass: batch-tiled grid, weights replicated (block 0) per step.
# --------------------------------------------------------------------------
def lista_encoder_forward(y, params, num_iter):
    """y: (B, C, H, W) float32. Returns Z: (B, code_dim) float32."""
    Wt, bias_p, St = params["Wt"], params["bias"], params["St"]
    code_dim, in_dim, cp = params["code_dim"], params["in_dim"], params["cp"]

    B = y.shape[0]
    y_flat = y.reshape(B, -1)                     # == y.view(B, -1)
    assert y_flat.shape[1] == in_dim

    # Batch tile: multiple of 8 sublanes, capped for VMEM / pipelining.
    tb = min(_MAX_BATCH_TILE, _round_up(B, _SUBLANE))
    bp = _round_up(B, tb)
    if bp != B:
        y_flat = jnp.zeros((bp, in_dim), y_flat.dtype).at[:B].set(y_flat)
    grid = (bp // tb,)

    flops = 2 * bp * in_dim * cp + 2 * num_iter * bp * cp * cp
    bytes_accessed = (bp * in_dim * 4          # y (f32 in)
                      + Wt.size * 2            # W.T (bf16)
                      + bias_p.size * 4
                      + St.size * 4
                      + bp * cp * 4)           # out (f32)

    kernel = functools.partial(_lista_kernel, num_iter=num_iter)

    out = pl.pallas_call(
        kernel,
        out_shape=jax.ShapeDtypeStruct((bp, cp), jnp.float32),
        grid=grid,
        in_specs=[
            pl.BlockSpec((tb, in_dim), lambda i: (i, 0)),   # y tile (blocked)
            pl.BlockSpec((in_dim, cp), lambda i: (0, 0)),   # W.T  (resident)
            pl.BlockSpec((1, cp),      lambda i: (0, 0)),   # bias (resident)
            pl.BlockSpec((cp, cp),     lambda i: (0, 0)),   # S.T  (resident)
        ],
        out_specs=pl.BlockSpec((tb, cp), lambda i: (i, 0)),
        compiler_params=pltpu.CompilerParams(
            dimension_semantics=("parallel",)),
        cost_estimate=pl.CostEstimate(flops=flops, transcendentals=0,
                                      bytes_accessed=bytes_accessed),
    )(y_flat, Wt, bias_p, St)

    return out[:B, :code_dim]


# --------------------------------------------------------------------------
# Pure-JAX f32 reference mirroring the PyTorch module.
# --------------------------------------------------------------------------
def reference_forward(y, W, bias, S, num_iter):
    Bm = y.reshape(y.shape[0], -1) @ W.T + bias[None, :]
    Z = jnp.maximum(Bm, 0.0)
    for _ in range(num_iter):
        Z = jnp.maximum(Bm + Z @ S.T, 0.0)
    return Z


if __name__ == "__main__":
    # Small shapes consistent with the module:
    # im_size=16, patch_size=0 (unused), n_channels=4, code_dim=32,
    # num_iter_LISTA=3, batch=2.
    batch = 2
    n_channels = 4
    im_size = 16
    code_dim = 32
    num_iter = 3
    in_dim = n_channels * im_size ** 2            # 1024

    key = jax.random.PRNGKey(0)
    k_y, k_w, k_s = jax.random.split(key, 3)

    y = jax.random.normal(k_y, (batch, n_channels, im_size, im_size), jnp.float32)
    # Deterministic synthetic parameters (no checkpoint load).
    W = jax.random.normal(k_w, (code_dim, in_dim), jnp.float32) * 0.02
    bias = jnp.zeros((code_dim,), jnp.float32)    # module fills bias with 0
    S = jax.random.normal(k_s, (code_dim, code_dim), jnp.float32) * 0.05

    # One-time weight prep (cache across calls).
    params = prepare_lista_params(W, bias, S)
    params = jax.tree_util.tree_map(
        lambda x: jax.block_until_ready(x) if isinstance(x, jax.Array) else x,
        params)

    out = lista_encoder_forward(y, params, num_iter)
    out = jax.block_until_ready(out)

    ref = reference_forward(y, W, bias, S, num_iter)
    assert out.shape == (batch, code_dim)
    # bf16 W on the first matmul only; recurrence is f32 -> tight error bound.
    assert jnp.allclose(out, ref, atol=2e-2, rtol=2e-2), "mismatch vs reference"

    print("KERNEL_OK")
</pallas_src>

<mosaic_0001>
module attributes {stable_mosaic.version = 11 : i64} {
  func.func @_lista_kernel(%arg0: i32, %arg1: memref<8x1024xf32, #tpu.memory_space<vmem>>, %arg2: memref<1024x128xbf16, #tpu.memory_space<vmem>>, %arg3: memref<1x128xf32, #tpu.memory_space<vmem>>, %arg4: memref<128x128xf32, #tpu.memory_space<vmem>>, %arg5: memref<8x128xf32, #tpu.memory_space<vmem>>) attributes {dimension_semantics = [#tpu.dimension_semantics<parallel>], iteration_bounds = array<i64: 1>, scalar_prefetch = 0 : i64, scratch_operands = 0 : i64, tpu.core_type = #tpu.core_type<tc>, window_params = [{transform_indices = @transform_0, window_bounds = array<i64: 8, 1024>}, {pipeline_mode = #tpu.pipeline_mode<synchronous>, transform_indices = @transform_1, window_bounds = array<i64: 1024, 128>}, {pipeline_mode = #tpu.pipeline_mode<synchronous>, transform_indices = @transform_2, window_bounds = array<i64: 1, 128>}, {pipeline_mode = #tpu.pipeline_mode<synchronous>, transform_indices = @transform_3, window_bounds = array<i64: 128, 128>}, {transform_indices = @transform_4, window_bounds = array<i64: 8, 128>}]} {
    %c0 = arith.constant 0 : index
    %c0_0 = arith.constant 0 : index
    %0 = vector.load %arg1[%c0, %c0_0] : memref<8x1024xf32, #tpu.memory_space<vmem>>, vector<8x1024xf32>
    %1 = arith.truncf %0 : vector<8x1024xf32> to vector<8x1024xbf16>
    %c0_1 = arith.constant 0 : index
    %c0_2 = arith.constant 0 : index
    %2 = vector.load %arg2[%c0_1, %c0_2] : memref<1024x128xbf16, #tpu.memory_space<vmem>>, vector<1024x128xbf16>
    %c0_3 = arith.constant 0 : index
    %c0_4 = arith.constant 0 : index
    %3 = vector.load %arg3[%c0_3, %c0_4] : memref<1x128xf32, #tpu.memory_space<vmem>>, vector<1x128xf32>
    %c0_5 = arith.constant 0 : index
    %c0_6 = arith.constant 0 : index
    %4 = vector.load %arg4[%c0_5, %c0_6] : memref<128x128xf32, #tpu.memory_space<vmem>>, vector<128x128xf32>
    %cst = arith.constant dense<0.000000e+00> : vector<8x128xf32>
    %5 = tpu.matmul %1, %2, %cst {dimension_numbers = #tpu.dot_dimension_numbers<[1], [0], [0], [1], [0, 0, 1, 1], [], []>} : vector<8x1024xbf16>, vector<1024x128xbf16>, vector<8x128xf32> -> vector<8x128xf32>
    %6 = vector.broadcast %3 : vector<1x128xf32> to vector<8x128xf32>
    %7 = arith.addf %5, %6 : vector<8x128xf32>
    %cst_7 = arith.constant 0.000000e+00 : f32
    %8 = vector.broadcast %cst_7 : f32 to vector<8x128xf32>
    %9 = arith.maximumf %7, %8 : vector<8x128xf32>
    %c0_i32 = arith.constant 0 : i32
    %cst_8 = arith.constant dense<0.000000e+00> : vector<8x128xf32>
    %10 = tpu.matmul %9, %4, %cst_8 {dimension_numbers = #tpu.dot_dimension_numbers<[1], [0], [0], [1], [0, 0, 1, 1], [], []>} : vector<8x128xf32>, vector<128x128xf32>, vector<8x128xf32> -> vector<8x128xf32>
    %11 = arith.addf %7, %10 : vector<8x128xf32>
    %cst_9 = arith.constant 0.000000e+00 : f32
    %12 = vector.broadcast %cst_9 : f32 to vector<8x128xf32>
    %13 = arith.maximumf %11, %12 : vector<8x128xf32>
    %c1_i32 = arith.constant 1 : i32
    %cst_10 = arith.constant dense<0.000000e+00> : vector<8x128xf32>
    %14 = tpu.matmul %13, %4, %cst_10 {dimension_numbers = #tpu.dot_dimension_numbers<[1], [0], [0], [1], [0, 0, 1, 1], [], []>} : vector<8x128xf32>, vector<128x128xf32>, vector<8x128xf32> -> vector<8x128xf32>
    %15 = arith.addf %7, %14 : vector<8x128xf32>
    %cst_11 = arith.constant 0.000000e+00 : f32
    %16 = vector.broadcast %cst_11 : f32 to vector<8x128xf32>
    %17 = arith.maximumf %15, %16 : vector<8x128xf32>
    %c2_i32 = arith.constant 2 : i32
    %cst_12 = arith.constant dense<0.000000e+00> : vector<8x128xf32>
    %18 = tpu.matmul %17, %4, %cst_12 {dimension_numbers = #tpu.dot_dimension_numbers<[1], [0], [0], [1], [0, 0, 1, 1], [], []>} : vector<8x128xf32>, vector<128x128xf32>, vector<8x128xf32> -> vector<8x128xf32>
    %19 = arith.addf %7, %18 : vector<8x128xf32>
    %cst_13 = arith.constant 0.000000e+00 : f32
    %20 = vector.broadcast %cst_13 : f32 to vector<8x128xf32>
    %21 = arith.maximumf %19, %20 : vector<8x128xf32>
    %c0_14 = arith.constant 0 : index
    %c0_15 = arith.constant 0 : index
    %22 = vector.load %arg5[%c0_14, %c0_15] : memref<8x128xf32, #tpu.memory_space<vmem>>, vector<8x128xf32>
    tpu.vector_store %arg5[%c0_14, %c0_15], %21 {strides = array<i32>} : memref<8x128xf32, #tpu.memory_space<vmem>>, vector<8x128xf32>,
    return
  }
  func.func @transform_0(%arg0: i32) -> (i32, i32) {
    %c0_i32 = arith.constant 0 : i32
    %c0_i32_0 = arith.constant 0 : i32
    return %arg0, %c0_i32 : i32, i32
  }
  func.func @transform_1(%arg0: i32) -> (i32, i32) {
    %c0_i32 = arith.constant 0 : i32
    %c0_i32_0 = arith.constant 0 : i32
    %c0_i32_1 = arith.constant 0 : i32
    return %c0_i32, %c0_i32_0 : i32, i32
  }
  func.func @transform_2(%arg0: i32) -> (i32, i32) {
    %c0_i32 = arith.constant 0 : i32
    %c0_i32_0 = arith.constant 0 : i32
    %c0_i32_1 = arith.constant 0 : i32
    return %c0_i32, %c0_i32_0 : i32, i32
  }
  func.func @transform_3(%arg0: i32) -> (i32, i32) {
    %c0_i32 = arith.constant 0 : i32
    %c0_i32_0 = arith.constant 0 : i32
    %c0_i32_1 = arith.constant 0 : i32
    return %c0_i32, %c0_i32_0 : i32, i32
  }
  func.func @transform_4(%arg0: i32) -> (i32, i32) {
    %c0_i32 = arith.constant 0 : i32
    %c0_i32_0 = arith.constant 0 : i32
    return %arg0, %c0_i32 : i32, i32
  }
}

</mosaic_0001>

<bundles_post_ra>
// kernel: tpu_custom_call.1
= control target key start
LH: loop header
LB: loop body
LE: loop exit
PB: predicated region body
PF: predicated region fallthrough
CT: control target
= control target key end

     0   :  { %9 = vsyncpa [#allocation3], 0  ;;  %s1656_s0 = inlined_call_operand.hbm [shape: f32[8,1024], index: 0, kind: input, shape index: {}]   ;;  %s1657_s1 = inlined_call_operand.hbm [shape: bf16[1024,128], index: 1, kind: input, shape index: {}]   ;;  %s1658_s2 = inlined_call_operand.vmem [shape: f32[1,128], index: 2, kind: input, shape index: {}]   ;;  %s1659_s3 = inlined_call_operand.hbm [shape: f32[128,128], index: 3, kind: input, shape index: {}]   ;;  %s1660_s4 = inlined_call_operand.hbm [shape: f32[8,128], index: 4, kind: output, shape index: {}]  }
   0x1   :  { %10 = vsyncpa [#allocation6], 0 }
   0x2   :  { %11 = vsyncpa [#allocation4], 0  ;;  %s1472_s15 = smov [#allocation5]  }
   0x3   :  { %s27_s16 = sshll.u32 %s1472_s15, 4  ;;  %s28_s16 = int_to_ptr.vmem [resolvable:$true] %s27_s16 }
   0x4   :  { %s1394_s17 = scalar_lea.vmem %s28_s16, 8192  ;;  %p1399_p1 = scmp.lt.s32.totalorder %s28_s16, %s28_s16 }
   0x5   :  { %p1395_p0 = scmp.ne.s32.totalorder %s28_s16, %s1394_s17  ;;  %p1400_p2 = scmp.lt.s32.totalorder %s1394_s17, %s1394_s17 }
   0x7   :  { %p1401_p3 = por %p1400_p2, %p1399_p1 }
   0x9   :  { %p1402_p4 = pnand %p1401_p3, %p1395_p0 }
   0xb   :  { %1405 = shalt.err (!%p1402_p4)
}
   0xc   :  { %s1473_s18 = smov 64   ;;  %s1474_s19 = smov 4  }
   0xd   :  { %33 = dma.hbm_to_vmem [thread:$0]  %s1657_s1, 8192, %s28_s16, [#allocation6], %s1473_s18, %s1473_s18, %s1474_s19  }
   0xe   :  { %s1475_s22 = smov [#allocation2]   ;;  %s1476_s24 = smov [#allocation7]  }
   0xf   :  { %s18_s23 = sshll.u32 %s1475_s22, 4  ;;  %s41_s25 = sshll.u32 %s1476_s24, 4  ;;  %s19_s23 = int_to_ptr.vmem [resolvable:$true] %s18_s23  ;;  %s42_s25 = int_to_ptr.vmem [resolvable:$true] %s41_s25 }
  0x10   :  { %s1414_s26 = scalar_lea.vmem %s19_s23, 1024  ;;  %p1419_p6 = scmp.lt.s32.totalorder %s19_s23, %s19_s23 }
  0x11   :  { %p1415_p5 = scmp.ne.s32.totalorder %s19_s23, %s1414_s26  ;;  %p1420_p7 = scmp.lt.s32.totalorder %s1414_s26, %s1414_s26 }
  0x13   :  { %p1421_p8 = por %p1420_p7, %p1419_p6 }
  0x15   :  { %p1422_p9 = pnand %p1421_p8, %p1415_p5 }
  0x17   :  { %1425 = shalt.err (!%p1422_p9)
}
  0x18   :  { %21 = dma.hbm_to_vmem [thread:$0]  %s1656_s0, 1024, %s19_s23, [#allocation3]  }
  0x19   :  { %s1434_s29 = scalar_lea.vmem %s42_s25, 2048  ;;  %p1439_p11 = scmp.lt.s32.totalorder %s42_s25, %s42_s25 }
  0x1a   :  { %p1435_p10 = scmp.ne.s32.totalorder %s42_s25, %s1434_s29  ;;  %p1440_p12 = scmp.lt.s32.totalorder %s1434_s29, %s1434_s29 }
  0x1c   :  { %p1441_p13 = por %p1440_p12, %p1439_p11 }
  0x1e   :  { %p1442_p0 = pnand %p1441_p13, %p1435_p10 }
  0x20   :  { %1445 = shalt.err (!%p1442_p0)
}
  0x21   :  { %s1477_s1 = smov 128   ;;  %s1478_s30 = smov 8  }
  0x22   :  { %47 = dma.hbm_to_vmem [thread:$0]  %s1659_s3, 2048, %s42_s25, [#allocation6], %s1477_s1, %s1477_s1, %s1478_s30  }
  0x23   :  { %1466 = dma.done.wait [#allocation3], 1024  }
  0x24   :  { %1467 = vsyncadd [#allocation3], 4294966272 }
  0x25   :  { %1468 = dma.done.wait [#allocation6], 10240  }
  0x26   :  { %1469 = vsyncadd [#allocation6], 4294957056  ;;  %v1322_v0 = vld [vmem:[#allocation5 + $0x78] sm:$0xff]   ;;  %v1326_v4 = vld [vmem:[#allocation5 + $0x70] sm:$0xff]   ;;  %vm1480_vm0 = vmmov 0  }
  0x27   :  { %v1323_v1 = vld [vmem:[#allocation5 + $0xf8] sm:$0xff]   ;;  %1068 = vmatprep.subr.bf16.mxu0 %v1322_v0  ;;  %v1327_v5 = vld [vmem:[#allocation5 + $0xf0] sm:$0xff]   ;;  %v1330_v8 = vld [vmem:[#allocation5 + $0x68] sm:$0xff]  }
  0x28   :  { %v1324_v2 = vld [vmem:[#allocation5 + $0x38] sm:$0xff]   ;;  %1090 = vmatprep.subr.bf16.mxu1 %v1323_v1  ;;  %v1328_v6 = vld [vmem:[#allocation5 + $0x30] sm:$0xff]   ;;  %v1331_v9 = vld [vmem:[#allocation5 + $0xe8] sm:$0xff]  }
  0x29   :  { %v1325_v3 = vld [vmem:[#allocation5 + $0xb8] sm:$0xff]   ;;  %1069 = vmatpush3.bf16.msra.mxu0 %v1324_v2  ;;  %v1329_v7 = vld [vmem:[#allocation5 + $0xb0] sm:$0xff]   ;;  %v1332_v10 = vld [vmem:[#allocation5 + $0x28] sm:$0xff]  }
  0x2a   :  { %1091 = vmatpush3.bf16.msra.mxu1 %v1325_v3  ;;  %1070 = vmatprep.subr.bf16.mxu0 %v1326_v4  ;;  %v1333_v11 = vld [vmem:[#allocation5 + $0xa8] sm:$0xff]   ;;  %v1334_v12 = vld [vmem:[#allocation5 + $0x60] sm:$0xff]   ;;  %v1338_v16 = vld [vmem:[#allocation5 + $0x58] sm:$0xff]  }
  0x2b   :  { %1092 = vmatprep.subr.bf16.mxu1 %v1327_v5  ;;  %v1335_v13 = vld [vmem:[#allocation5 + $0xe0] sm:$0xff]   ;;  %v1339_v17 = vld [vmem:[#allocation5 + $0xd8] sm:$0xff]   ;;  %v1342_v20 = vld [vmem:[#allocation5 + $0x50] sm:$0xff]  }
  0x2c   :  { %v1336_v14 = vld [vmem:[#allocation5 + $0x20] sm:$0xff]   ;;  %v1340_v18 = vld [vmem:[#allocation5 + $0x18] sm:$0xff]   ;;  %v1343_v21 = vld [vmem:[#allocation5 + $0xd0] sm:$0xff]  }
  0x2d   :  { %1071 = vmatpush3.bf16.msra.mxu0 %v1328_v6  ;;  %v1337_v15 = vld [vmem:[#allocation5 + $0xa0] sm:$0xff]   ;;  %v1341_v19 = vld [vmem:[#allocation5 + $0x98] sm:$0xff]   ;;  %v1344_v22 = vld [vmem:[#allocation5 + $0x10] sm:$0xff]  }
  0x2e   :  { %1093 = vmatpush3.bf16.msra.mxu1 %v1329_v7  ;;  %1072 = vmatprep.subr.bf16.mxu0 %v1330_v8  ;;  %v1345_v23 = vld [vmem:[#allocation5 + $0x90] sm:$0xff]   ;;  %v1346_v24 = vld [vmem:[#allocation5 + $0x48] sm:$0xff]   ;;  %v1350_v28 = vld [vmem:[#allocation5 + $0x40] sm:$0xff]  }
  0x2f   :  { %1094 = vmatprep.subr.bf16.mxu1 %v1331_v9  ;;  %v1347_v25 = vld [vmem:[#allocation5 + $0xc8] sm:$0xff]   ;;  %v1351_v29 = vld [vmem:[#allocation5 + $0xc0] sm:$0xff]   ;;  %v61_v33 = vld [vmem:[#allocation2 + $0x18] sm:$0xff] }
  0x30   :  { %v1348_v26 = vld [vmem:[#allocation5 + $0x8] sm:$0xff]   ;;  %v1352_v30 = vld [vmem:[#allocation5] sm:$0xff]   ;;  %v69_v36 = vpack.c.bf16 %v61_v33, %v61_v33  ;;  %v60_v38 = vld [vmem:[#allocation2 + $0x10] sm:$0xff] }
  0x31   :  { %1073 = vmatpush3.bf16.msra.mxu0 %v1332_v10  ;;  %v1349_v27 = vld [vmem:[#allocation5 + $0x88] sm:$0xff]   ;;  %v1353_v31 = vld [vmem:[#allocation5 + $0x80] sm:$0xff]   ;;  %v68_v39 = vpack.c.bf16 %v60_v38, %v60_v38  ;;  %v1354_v40 = vld [vmem:[#allocation5 + $0x178] sm:$0xff]  }
  0x32   :  { %1095 = vmatpush3.bf16.msra.mxu1 %v1333_v11  ;;  %1074 = vmatprep.subr.bf16.mxu0 %v1334_v12  ;;  %v59_v32 = vld [vmem:[#allocation2 + $0x8] sm:$0xff]  ;;  %v58_v34 = vld [vmem:[#allocation2] sm:$0xff]  ;;  %v1355_v41 = vld [vmem:[#allocation5 + $0x1f8] sm:$0xff]  }
  0x33   :  { %1096 = vmatprep.subr.bf16.mxu1 %v1335_v13  ;;  %v67_v35 = vpack.c.bf16 %v59_v32, %v59_v32  ;;  %v66_v37 = vpack.c.bf16 %v58_v34, %v58_v34  ;;  %681 = vmatprep.mubr.bf16.mxu1 %v69_v36  ;;  %v1356_v42 = vld [vmem:[#allocation5 + $0x138] sm:$0xff]   ;;  %v1358_v44 = vld [vmem:[#allocation5 + $0x170] sm:$0xff]   ;;  %v1362_v48 = vld [vmem:[#allocation5 + $0x168] sm:$0xff]  }
  0x34   :  { %v1357_v43 = vld [vmem:[#allocation5 + $0x1b8] sm:$0xff]   ;;  %v1359_v45 = vld [vmem:[#allocation5 + $0x1f0] sm:$0xff]   ;;  %v1363_v49 = vld [vmem:[#allocation5 + $0x1e8] sm:$0xff]  }
  0x35   :  { %1075 = vmatpush3.bf16.msra.mxu0 %v1336_v14  ;;  %641 = vmatprep.mubr.bf16.mxu0 %v67_v35  ;;  %v1360_v46 = vld [vmem:[#allocation5 + $0x130] sm:$0xff]   ;;  %v1364_v50 = vld [vmem:[#allocation5 + $0x128] sm:$0xff]   ;;  %v1366_v52 = vld [vmem:[#allocation5 + $0x160] sm:$0xff]  }
  0x36   :  { %1097 = vmatpush3.bf16.msra.mxu1 %v1337_v15  ;;  %1076 = vmatprep.subr.bf16.mxu0 %v1338_v16  ;;  %v1361_v47 = vld [vmem:[#allocation5 + $0x1b0] sm:$0xff]   ;;  %v1365_v51 = vld [vmem:[#allocation5 + $0x1a8] sm:$0xff]   ;;  %v1367_v53 = vld [vmem:[#allocation5 + $0x1e0] sm:$0xff]  }
  0x37   :  { %1098 = vmatprep.subr.bf16.mxu1 %v1339_v17  ;;  %v1368_v54 = vld [vmem:[#allocation5 + $0x120] sm:$0xff]   ;;  %v1370_v56 = vld [vmem:[#allocation5 + $0x158] sm:$0xff]   ;;  %v1374_v60 = vld [vmem:[#allocation5 + $0x150] sm:$0xff]   ;;  %v1479_v17 = vmov 0.0  }
  0x38   :  { %v1369_v55 = vld [vmem:[#allocation5 + $0x1a0] sm:$0xff]   ;;  %v1371_v57 = vld [vmem:[#allocation5 + $0x1d8] sm:$0xff]   ;;  %v1375_v61 = vld [vmem:[#allocation5 + $0x1d0] sm:$0xff]  }
  0x39   :  { %1077 = vmatpush3.bf16.msra.mxu0 %v1340_v18  ;;  %v1372_v58 = vld [vmem:[#allocation5 + $0x118] sm:$0xff]   ;;  %v1376_v62 = vld [vmem:[#allocation5 + $0x110] sm:$0xff]   ;;  %v1378_v0 = vld [vmem:[#allocation5 + $0x148] sm:$0xff]  }
  0x3a   :  { %1099 = vmatpush3.bf16.msra.mxu1 %v1341_v19  ;;  %1078 = vmatprep.subr.bf16.mxu0 %v1342_v20  ;;  %v1373_v59 = vld [vmem:[#allocation5 + $0x198] sm:$0xff]   ;;  %v1377_v63 = vld [vmem:[#allocation5 + $0x190] sm:$0xff]   ;;  %v1379_v1 = vld [vmem:[#allocation5 + $0x1c8] sm:$0xff]  }
  0x3b   :  { %1100 = vmatprep.subr.bf16.mxu1 %v1343_v21  ;;  %v1380_v2 = vld [vmem:[#allocation5 + $0x108] sm:$0xff]   ;;  %v1382_v4 = vld [vmem:[#allocation5 + $0x140] sm:$0xff]   ;;  %v65_v9 = vld [vmem:[#allocation2 + $0x38] sm:$0xff] }
  0x3c   :  { %v1381_v3 = vld [vmem:[#allocation5 + $0x188] sm:$0xff]   ;;  %v1383_v5 = vld [vmem:[#allocation5 + $0x1c0] sm:$0xff]   ;;  %v73_v11 = vpack.c.bf16 %v65_v9, %v65_v9  ;;  %v64_v13 = vld [vmem:[#allocation2 + $0x30] sm:$0xff] }
  0x3d   :  { %1079 = vmatpush3.bf16.msra.mxu0 %v1344_v22  ;;  %v1384_v6 = vld [vmem:[#allocation5 + $0x100] sm:$0xff]   ;;  %v63_v8 = vld [vmem:[#allocation2 + $0x28] sm:$0xff]  ;;  %v72_v15 = vpack.c.bf16 %v64_v13, %v64_v13  ;;  %v1516_v16 = vld [vmem:[#allocation7 + $0x78] sm:$0xff] }
  0x3e   :  { %1101 = vmatpush3.bf16.msra.mxu1 %v1345_v23  ;;  %1080 = vmatprep.subr.bf16.mxu0 %v1346_v24  ;;  %v1385_v7 = vld [vmem:[#allocation5 + $0x180] sm:$0xff]   ;;  %v71_v10 = vpack.c.bf16 %v63_v8, %v63_v8  ;;  %v1519_v18 = vld [vmem:[#allocation7 + $0x70] sm:$0xff]  ;;  %v1525_v19 = vld [vmem:[#allocation7 + $0x68] sm:$0xff] }
  0x3f   :  { %1102 = vmatprep.subr.bf16.mxu1 %v1347_v25  ;;  %v62_v12 = vld [vmem:[#allocation2 + $0x20] sm:$0xff]  ;;  %v1537_v21 = vld [vmem:[#allocation7 + $0x58] sm:$0xff]  ;;  %v1543_v22 = vld [vmem:[#allocation7 + $0x50] sm:$0xff] }
  0x40   :  { %v70_v14 = vpack.c.bf16 %v62_v12, %v62_v12  ;;  %v1531_v20 = vld [vmem:[#allocation7 + $0x60] sm:$0xff]  ;;  %v1549_v23 = vld [vmem:[#allocation7 + $0x48] sm:$0xff]  ;;  %v1561_v25 = vld [vmem:[#allocation7 + $0x38] sm:$0xff] }
  0x41   :  { %1081 = vmatpush3.bf16.msra.mxu0 %v1348_v26  ;;  %v1555_v24 = vld [vmem:[#allocation7 + $0x40] sm:$0xff]  ;;  %v1567_v26 = vld [vmem:[#allocation7 + $0x30] sm:$0xff] }
  0x42   :  { %1103 = vmatpush3.bf16.msra.mxu1 %v1349_v27  ;;  %1082 = vmatprep.subr.bf16.mxu0 %v1350_v28  ;;  %v1578_v27 = vld [vmem:[#allocation7 + $0x28] sm:$0xff]  ;;  %v1583_v28 = vld [vmem:[#allocation7 + $0x20] sm:$0xff] }
  0x43   :  { %1104 = vmatprep.subr.bf16.mxu1 %v1351_v29  ;;  %v1589_v29 = vld [vmem:[#allocation7 + $0x18] sm:$0xff]  ;;  %v1603_v32 = vld [vmem:[#allocation7] sm:$0xff] }
  0x45   :  { %1083 = vmatpush3.bf16.msra.mxu0 %v1352_v30  ;;  %v1595_v30 = vld [vmem:[#allocation7 + $0x10] sm:$0xff] }
  0x46   :  { %1105 = vmatpush3.bf16.msra.mxu1 %v1353_v31  ;;  %1112 = vmatprep.subr.bf16.mxu0 %v1354_v40  ;;  %v1599_v31 = vld [vmem:[#allocation7 + $0x8] sm:$0xff] }
  0x47   :  { %1134 = vmatprep.subr.bf16.mxu1 %v1355_v41 }
  0x48   :  { %642 = vmatmul.mubr.bf16.vlgmr.msra.gmra.mxu0 %v66_v37 }
  0x49   :  { %682 = vmatmul.mubr.bf16.vlgmr.msra.gmra.mxu1 %v68_v39  ;;  %1113 = vmatpush3.bf16.msra.mxu0 %v1356_v42  ;;  %v1003_v42 = vld [vmem:[%s1658_s2] ss:$0 sm:$0xff]  ;;  %s1481_s2 = smov [#allocation8]  }
  0x4a   :  { %1135 = vmatpush3.bf16.msra.mxu1 %v1357_v43  ;;  %1114 = vmatprep.subr.bf16.mxu0 %v1358_v44  ;;  %s993_s7 = sshll.u32 %s1481_s2, 4  ;;  %s994_s7 = int_to_ptr.vmem [resolvable:$true] %s993_s7 }
  0x4b   :  { %1136 = vmatprep.subr.bf16.mxu1 %v1359_v45  ;;  %721 = vmatprep.mubr.bf16.mxu0 %v71_v10  ;;  %s1446_s8 = scalar_lea.vmem %s994_s7, 128  ;;  %p1451_p2 = scmp.lt.s32.totalorder %s994_s7, %s994_s7 }
  0x4c   :  { %761 = vmatprep.mubr.bf16.mxu1 %v73_v11  ;;  %p1447_p1 = scmp.ne.s32.totalorder %s994_s7, %s1446_s8  ;;  %p1452_p3 = scmp.lt.s32.totalorder %s1446_s8, %s1446_s8 }
  0x4d   :  { %1115 = vmatpush3.bf16.msra.mxu0 %v1360_v46 }
  0x4e   :  { %1137 = vmatpush3.bf16.msra.mxu1 %v1361_v47  ;;  %1116 = vmatprep.subr.bf16.mxu0 %v1362_v48  ;;  %p1453_p4 = por %p1452_p3, %p1451_p2 }
  0x4f   :  { %1138 = vmatprep.subr.bf16.mxu1 %v1363_v49 }
  0x50   :  { %p1454_p5 = pnand %p1453_p4, %p1447_p1 }
  0x51   :  { %1117 = vmatpush3.bf16.msra.mxu0 %v1364_v50 }
  0x52   :  { %1139 = vmatpush3.bf16.msra.mxu1 %v1365_v51  ;;  %1118 = vmatprep.subr.bf16.mxu0 %v1366_v52 }
  0x53   :  { %1140 = vmatprep.subr.bf16.mxu1 %v1367_v53 }
  0x55   :  { %1119 = vmatpush3.bf16.msra.mxu0 %v1368_v54 }
  0x56   :  { %1141 = vmatpush3.bf16.msra.mxu1 %v1369_v55  ;;  %1120 = vmatprep.subr.bf16.mxu0 %v1370_v56 }
  0x57   :  { %1142 = vmatprep.subr.bf16.mxu1 %v1371_v57 }
  0x59   :  { %1121 = vmatpush3.bf16.msra.mxu0 %v1372_v58 }
  0x5a   :  { %1143 = vmatpush3.bf16.msra.mxu1 %v1373_v59  ;;  %1122 = vmatprep.subr.bf16.mxu0 %v1374_v60 }
  0x5b   :  { %1144 = vmatprep.subr.bf16.mxu1 %v1375_v61 }
  0x5d   :  { %1123 = vmatpush3.bf16.msra.mxu0 %v1376_v62 }
  0x5e   :  { %1145 = vmatpush3.bf16.msra.mxu1 %v1377_v63  ;;  %1124 = vmatprep.subr.bf16.mxu0 %v1378_v0 }
  0x5f   :  { %1146 = vmatprep.subr.bf16.mxu1 %v1379_v1 }
  0x61   :  { %1125 = vmatpush3.bf16.msra.mxu0 %v1380_v2 }
  0x62   :  { %1147 = vmatpush3.bf16.msra.mxu1 %v1381_v3  ;;  %1126 = vmatprep.subr.bf16.mxu0 %v1382_v4 }
  0x63   :  { %1148 = vmatprep.subr.bf16.mxu1 %v1383_v5 }
  0x65   :  { %1127 = vmatpush3.bf16.msra.mxu0 %v1384_v6 }
  0x66   :  { %1149 = vmatpush3.bf16.msra.mxu1 %v1385_v7  ;;  %1207 = vmatprep.subr.mxu0 %v1479_v17 }
  0x67   :  { %1242 = vmatprep.subr.mxu1 %v1479_v17 }
  0x68   :  { %722 = vmatmul.mubr.bf16.vlgmr.msra.gmra.mxu0 %v70_v14 }
  0x69   :  { %762 = vmatmul.mubr.bf16.vlgmr.msra.gmra.mxu1 %v72_v15  ;;  %1208 = vmatpush3.msra.mxu0 %v1516_v16 }
  0x6a   :  { %1243 = vmatpush3.msra.mxu1 %v1516_v16  ;;  %1209 = vmatprep.subr.mxu0 %v1479_v17 }
  0x6b   :  { %1244 = vmatprep.subr.mxu1 %v1479_v17  ;;  %1210 = vmatpush3.msra.mxu0 %v1519_v18 }
  0x6c   :  { %1245 = vmatpush3.msra.mxu1 %v1519_v18  ;;  %1211 = vmatprep.subr.mxu0 %v1479_v17 }
  0x6d   :  { %1246 = vmatprep.subr.mxu1 %v1479_v17  ;;  %1212 = vmatpush3.msra.mxu0 %v1525_v19 }
  0x6e   :  { %1247 = vmatpush3.msra.mxu1 %v1525_v19  ;;  %1213 = vmatprep.subr.mxu0 %v1479_v17 }
  0x6f   :  { %1248 = vmatprep.subr.mxu1 %v1479_v17  ;;  %1214 = vmatpush3.msra.mxu0 %v1531_v20 }
  0x70   :  { %1249 = vmatpush3.msra.mxu1 %v1531_v20  ;;  %1215 = vmatprep.subr.mxu0 %v1479_v17 }
  0x71   :  { %1250 = vmatprep.subr.mxu1 %v1479_v17  ;;  %1216 = vmatpush3.msra.mxu0 %v1537_v21 }
  0x72   :  { %1251 = vmatpush3.msra.mxu1 %v1537_v21  ;;  %1217 = vmatprep.subr.mxu0 %v1479_v17 }
  0x73   :  { %1252 = vmatprep.subr.mxu1 %v1479_v17  ;;  %1218 = vmatpush3.msra.mxu0 %v1543_v22 }
  0x74   :  { %1253 = vmatpush3.msra.mxu1 %v1543_v22  ;;  %1219 = vmatprep.subr.mxu0 %v1479_v17 }
  0x75   :  { %1254 = vmatprep.subr.mxu1 %v1479_v17  ;;  %1220 = vmatpush3.msra.mxu0 %v1549_v23 }
  0x76   :  { %1255 = vmatpush3.msra.mxu1 %v1549_v23  ;;  %1221 = vmatprep.subr.mxu0 %v1479_v17 }
  0x77   :  { %1256 = vmatprep.subr.mxu1 %v1479_v17  ;;  %1222 = vmatpush3.msra.mxu0 %v1555_v24 }
  0x78   :  { %1257 = vmatpush3.msra.mxu1 %v1555_v24  ;;  %1223 = vmatprep.subr.mxu0 %v1479_v17 }
  0x79   :  { %1258 = vmatprep.subr.mxu1 %v1479_v17  ;;  %1224 = vmatpush3.msra.mxu0 %v1561_v25 }
  0x7a   :  { %1259 = vmatpush3.msra.mxu1 %v1561_v25  ;;  %1225 = vmatprep.subr.mxu0 %v1479_v17 }
  0x7b   :  { %1260 = vmatprep.subr.mxu1 %v1479_v17  ;;  %1226 = vmatpush3.msra.mxu0 %v1567_v26 }
  0x7c   :  { %1261 = vmatpush3.msra.mxu1 %v1567_v26  ;;  %1227 = vmatprep.subr.mxu0 %v1479_v17 }
  0x7d   :  { %1262 = vmatprep.subr.mxu1 %v1479_v17  ;;  %1228 = vmatpush3.msra.mxu0 %v1578_v27 }
  0x7e   :  { %1263 = vmatpush3.msra.mxu1 %v1578_v27  ;;  %1229 = vmatprep.subr.mxu0 %v1479_v17 }
  0x7f   :  { %1264 = vmatprep.subr.mxu1 %v1479_v17  ;;  %1230 = vmatpush3.msra.mxu0 %v1583_v28 }
  0x80   :  { %1265 = vmatpush3.msra.mxu1 %v1583_v28  ;;  %1231 = vmatprep.subr.mxu0 %v1479_v17 }
  0x81   :  { %1266 = vmatprep.subr.mxu1 %v1479_v17  ;;  %1232 = vmatpush3.msra.mxu0 %v1589_v29 }
  0x82   :  { %1267 = vmatpush3.msra.mxu1 %v1589_v29  ;;  %1233 = vmatprep.subr.mxu0 %v1479_v17 }
  0x83   :  { %1268 = vmatprep.subr.mxu1 %v1479_v17  ;;  %1234 = vmatpush3.msra.mxu0 %v1595_v30 }
  0x84   :  { %1269 = vmatpush3.msra.mxu1 %v1595_v30  ;;  %1235 = vmatprep.subr.mxu0 %v1479_v17 }
  0x85   :  { %1239 = vmatprep.mubr.msk.f32.mxu0 %vm1480_vm0, %v1479_v17  ;;  %1236 = vmatpush3.msra.mxu0 %v1599_v31 }
  0x86   :  { %1270 = vmatprep.subr.mxu1 %v1479_v17  ;;  %1237 = vmatprep.subr.mxu0 %v1479_v17 }
  0x87   :  { %1271 = vmatpush3.msra.mxu1 %v1599_v31  ;;  %1238 = vmatpush3.msra.mxu0 %v1603_v32 }
  0x88   :  { %1272 = vmatprep.subr.mxu1 %v1479_v17  ;;  %1274 = vmatprep.mubr.msk.f32.mxu1 %vm1480_vm0, %v1479_v17 }
  0x89   :  { %1273 = vmatpush3.msra.mxu1 %v1603_v32  ;;  %1277 = vmatprep.subr.mxu0 %v1479_v17 }
 0x108   :  { %v1084_v33 = vpop.f32.mrf.mxu0 }
 0x109   :  { %v1106_v34 = vpop.f32.mrf.mxu1 }
 0x10a   :  { %v1085_v35 = vpop.f32.mrf.mxu0 }
 0x10b   :  { %v1107_v36 = vpop.f32.mrf.mxu1  ;;  %v1086_v41 = vadd.f32 %v1085_v35, %v1084_v33 }
 0x10c   :  { %v1087_v37 = vpop.f32.mrf.mxu0  ;;  %v1108_v44 = vadd.f32 %v1107_v36, %v1106_v34 }
 0x10d   :  { %v1109_v38 = vpop.f32.mrf.mxu1  ;;  %v644_v43 = vadd.f32 %v1086_v41, %v1003_v42 }
 0x10e   :  { %v1088_v39 = vpop.f32.mrf.mxu0 }
 0x10f   :  { %v1110_v40 = vpop.f32.mrf.mxu1  ;;  %v684_v48 = vadd.f32 %v1108_v44, %v644_v43 }
 0x128   :  { %v1128_v45 = vpop.f32.mrf.mxu0 }
 0x129   :  { %v1150_v46 = vpop.f32.mrf.mxu1 }
 0x12a   :  { %v1129_v47 = vpop.f32.mrf.mxu0 }
 0x12b   :  { %v1130_v49 = vadd.f32 %v1129_v47, %v1128_v45  ;;  %v1151_v50 = vpop.f32.mrf.mxu1 }
 0x12c   :  { %v1131_v51 = vpop.f32.mrf.mxu0  ;;  %v1152_v53 = vadd.f32 %v1151_v50, %v1150_v46 }
 0x12d   :  { %v724_v52 = vadd.f32 %v1130_v49, %v684_v48  ;;  %v1153_v54 = vpop.f32.mrf.mxu1 }
 0x12e   :  { %v1132_v55 = vpop.f32.mrf.mxu0 }
 0x12f   :  { %v764_v56 = vadd.f32 %v1152_v53, %v724_v52  ;;  %v1154_v57 = vpop.f32.mrf.mxu1 }
 0x131   :  { %v769_v58 = vmax.f32 %v764_v56, 0.0 }
 0x133   :  { %1240 = vmatmul.mubr.f32.vlgmr.msra.gmra.mxu0 %v769_v58 }
 0x134   :  { %1278 = vmatpush3.msra.mxu0 %v1516_v16  ;;  %1309 = vmatprep.mubr.msk.f32.mxu0 %vm1480_vm0, %v1479_v17 }
 0x135   :  { %1279 = vmatprep.subr.mxu0 %v1479_v17 }
 0x136   :  { %1280 = vmatpush3.msra.mxu0 %v1519_v18 }
 0x137   :  { %1281 = vmatprep.subr.mxu0 %v1479_v17 }
 0x138   :  { %1282 = vmatpush3.msra.mxu0 %v1525_v19 }
 0x139   :  { %1283 = vmatprep.subr.mxu0 %v1479_v17 }
 0x13a   :  { %1284 = vmatpush3.msra.mxu0 %v1531_v20 }
 0x13b   :  { %1285 = vmatprep.subr.mxu0 %v1479_v17 }
 0x13c   :  { %1286 = vmatpush3.msra.mxu0 %v1537_v21 }
 0x13d   :  { %1287 = vmatprep.subr.mxu0 %v1479_v17 }
 0x13e   :  { %1288 = vmatpush3.msra.mxu0 %v1543_v22 }
 0x13f   :  { %1289 = vmatprep.subr.mxu0 %v1479_v17 }
 0x140   :  { %1290 = vmatpush3.msra.mxu0 %v1549_v23 }
 0x141   :  { %1291 = vmatprep.subr.mxu0 %v1479_v17 }
 0x142   :  { %1292 = vmatpush3.msra.mxu0 %v1555_v24 }
 0x143   :  { %1293 = vmatprep.subr.mxu0 %v1479_v17 }
 0x144   :  { %1294 = vmatpush3.msra.mxu0 %v1561_v25 }
 0x145   :  { %1295 = vmatprep.subr.mxu0 %v1479_v17 }
 0x146   :  { %1296 = vmatpush3.msra.mxu0 %v1567_v26 }
 0x147   :  { %1297 = vmatprep.subr.mxu0 %v1479_v17 }
 0x148   :  { %1298 = vmatpush3.msra.mxu0 %v1578_v27 }
 0x149   :  { %1299 = vmatprep.subr.mxu0 %v1479_v17 }
 0x14a   :  { %1300 = vmatpush3.msra.mxu0 %v1583_v28 }
 0x14b   :  { %1301 = vmatprep.subr.mxu0 %v1479_v17 }
 0x14c   :  { %1302 = vmatpush3.msra.mxu0 %v1589_v29 }
 0x14d   :  { %1303 = vmatprep.subr.mxu0 %v1479_v17 }
 0x14e   :  { %1304 = vmatpush3.msra.mxu0 %v1595_v30 }
 0x14f   :  { %1305 = vmatprep.subr.mxu0 %v1479_v17 }
 0x150   :  { %1306 = vmatpush3.msra.mxu0 %v1599_v31 }
 0x151   :  { %1307 = vmatprep.subr.mxu0 %v1479_v17 }
 0x152   :  { %1308 = vmatpush3.msra.mxu0 %v1603_v32 }
 0x1f3   :  { %v836_v59 = vpop.f32.mrf.mxu0 }
 0x1f4   :  { %v840_v60 = vadd.f32 %v836_v59, %v764_v56 }
 0x1f5   :  { %v1241_v61 = vpop.f32.mrf.mxu0 }
 0x1f6   :  { %v841_v62 = vmax.f32 %v840_v60, 0.0 }
 0x1f8   :  { %1275 = vmatmul.mubr.f32.vlgmr.msra.gmra.mxu1 %v841_v62 }
 0x2b8   :  { %v908_v63 = vpop.f32.mrf.mxu1 }
 0x2b9   :  { %v912_v0 = vadd.f32 %v908_v63, %v764_v56 }
 0x2ba   :  { %v1276_v1 = vpop.f32.mrf.mxu1 }
 0x2bb   :  { %v913_v2 = vmax.f32 %v912_v0, 0.0 }
 0x2bd   :  { %1310 = vmatmul.mubr.f32.vlgmr.msra.gmra.mxu0 %v913_v2 }
 0x37d   :  { %v980_v3 = vpop.f32.mrf.mxu0 }
 0x37e   :  { %v984_v4 = vadd.f32 %v980_v3, %v764_v56 }
 0x37f   :  { %v1311_v5 = vpop.f32.mrf.mxu0 }
 0x380   :  { %v985_v6 = vmax.f32 %v984_v4, 0.0 }
 0x382   :  { %986 = vst [vmem:[#allocation8] sm:$0xff] %v985_v6 }
 0x383   :  { %1457 = shalt.err (!%p1454_p5)
}
 0x384   :  { %996 = dma.vmem_to_hbm [thread:$0]  %s994_s7, 128, %s1660_s4, [#allocation4]  }
 0x385   :  { %1470 = dma.done.wait [#allocation4], 128  }
 0x386   :  { %1471 = vsyncadd [#allocation4], 4294967168 }
 0x387   :  { %1000 = vsyncpa [#allocation3], 1 }
 0x388   :  { %1001 = vsyncpa [#allocation6], 1 }
 0x389   :  { %1002 = vsyncpa [#allocation4], 1 }

</bundles_post_ra>
